<compile_context>
chip_gen: v7x
topology: tpu7x:2x2x1
jax: 0.10.0
libtpu: 0.0.40
codegen_flags: <defaults>
</compile_context>

<pallas_src>
import math

import jax
import jax.numpy as jnp
from jax.experimental import pallas as pl
from jax.experimental.pallas import tpu as pltpu


# ---------------------------------------------------------------------------
# Kernels
# ---------------------------------------------------------------------------

def _eca_fused_kernel(x_ref, band_ref, o_ref):
    """Fused mean -> conv1d -> sigmoid -> scale for one batch element.

    x_ref    : (C, HW) block, native dtype (channels on sublanes, HW on lanes)
    band_ref : (C, C) f32 banded conv-1d matrix
    o_ref    : (C, HW) block
    """
    x = x_ref[...]                                    # keep native dtype (no tile cast)
    hw = x.shape[1]
    # Per-channel spatial mean, accumulated in f32 (lane-axis reduce).
    mean = jnp.sum(x, axis=1, keepdims=True, dtype=jnp.float32) * (1.0 / hw)   # (C, 1)
    # Zero-padded cross-correlation over channels as a tiny banded matvec.
    conv = jnp.dot(band_ref[...], mean, preferred_element_type=jnp.float32)    # (C, 1)
    scale = jax.nn.sigmoid(conv)                                               # (C, 1) f32
    o_ref[...] = x * scale.astype(x.dtype)            # broadcast over lane (HW) axis


def _eca_sum_kernel(x_ref, sum_ref):
    """Two-phase path, phase 1: accumulate per-channel spatial sums over HW tiles."""
    t = pl.program_id(1)

    @pl.when(t == 0)
    def _():
        sum_ref[...] = jnp.zeros_like(sum_ref)

    sum_ref[...] += jnp.sum(x_ref[...], axis=1, keepdims=True, dtype=jnp.float32)


def _eca_apply_kernel(x_ref, scale_ref, o_ref):
    """Two-phase path, phase 2: apply the per-channel scale to one HW tile."""
    o_ref[...] = x_ref[...] * scale_ref[...].astype(x_ref.dtype)


# ---------------------------------------------------------------------------
# Wrapper
# ---------------------------------------------------------------------------

def _band_matrix(conv_weight, C):
    """(C, C) matrix encoding the zero-padded Conv1d(1,1,K) cross-correlation."""
    K = conv_weight.shape[0]
    pad = K // 2
    w = conv_weight.astype(jnp.float32)
    idx = jnp.arange(C)
    t = idx[None, :] - idx[:, None] + pad             # tap index for (out i, in j)
    return jnp.where((t >= 0) & (t < K), w[jnp.clip(t, 0, K - 1)], 0.0)


def _pick_hw_block(HW, C, itemsize, vmem_limit_bytes):
    """Return None for the fused single-pass path, else an HW tile size."""
    # in + out, double buffered, plus slack for temps.
    if 5 * C * HW * itemsize <= vmem_limit_bytes:
        return None
    for blk in (8192, 4096, 2048, 1024, 512, 256, 128):
        if HW % blk == 0:
            return blk
    # TODO(synk): ragged HW tiling for huge feature maps whose HW has no
    # multiple-of-128 divisor; fall back to the fused path for now.
    return None


def eca_forward(x_nchw, conv_weight, *, hw_block=None,
                vmem_limit_bytes=64 * 1024 * 1024):
    """ECA forward.  x_nchw: (B, C, H, W); conv_weight: (K,) conv taps (no bias)."""
    B, C, H, W = x_nchw.shape
    HW = H * W
    x = x_nchw.reshape(B, C, HW)                      # free reshape, no transpose
    band = _band_matrix(conv_weight, C)               # (C, C) f32

    itemsize = x.dtype.itemsize
    if hw_block is None:
        hw_block = _pick_hw_block(HW, C, itemsize, vmem_limit_bytes)
    if hw_block is not None and (hw_block >= HW or HW % hw_block or hw_block % 128):
        hw_block = None                               # invalid tile request -> fused

    cparams = lambda sem: pltpu.CompilerParams(       # noqa: E731
        dimension_semantics=sem, vmem_limit_bytes=vmem_limit_bytes)

    if hw_block is None:
        # ---- Fused single pass: read x once, write y once -------------------
        out = pl.pallas_call(
            _eca_fused_kernel,
            out_shape=jax.ShapeDtypeStruct((B, C, HW), x.dtype),
            grid_spec=pltpu.PrefetchScalarGridSpec(
                num_scalar_prefetch=0,
                grid=(B,),
                in_specs=[
                    pl.BlockSpec((pl.Squeezed(), C, HW), lambda b: (b, 0, 0)),
                    pl.BlockSpec((C, C), lambda b: (0, 0)),
                ],
                out_specs=pl.BlockSpec((pl.Squeezed(), C, HW), lambda b: (b, 0, 0)),
            ),
            compiler_params=cparams(("parallel",)),
        )(x, band)
    else:
        # ---- Two-phase: tiled reduce, tiny JAX glue, tiled scale-apply ------
        T = HW // hw_block
        sums = pl.pallas_call(
            _eca_sum_kernel,
            out_shape=jax.ShapeDtypeStruct((B, C, 1), jnp.float32),
            grid_spec=pltpu.PrefetchScalarGridSpec(
                num_scalar_prefetch=0,
                grid=(B, T),
                in_specs=[
                    pl.BlockSpec((pl.Squeezed(), C, hw_block), lambda b, t: (b, 0, t)),
                ],
                out_specs=pl.BlockSpec((pl.Squeezed(), C, 1), lambda b, t: (b, 0, 0)),
            ),
            compiler_params=cparams(("parallel", "arbitrary")),
        )(x)
        mean = sums[:, :, 0] * (1.0 / HW)                       # (B, C) f32
        conv = mean @ band.T                                    # (B, C) f32
        scale = jax.nn.sigmoid(conv)[:, :, None]                # (B, C, 1) f32

        out = pl.pallas_call(
            _eca_apply_kernel,
            out_shape=jax.ShapeDtypeStruct((B, C, HW), x.dtype),
            grid_spec=pltpu.PrefetchScalarGridSpec(
                num_scalar_prefetch=0,
                grid=(B, T),
                in_specs=[
                    pl.BlockSpec((pl.Squeezed(), C, hw_block), lambda b, t: (b, 0, t)),
                    pl.BlockSpec((pl.Squeezed(), C, 1), lambda b, t: (b, 0, 0)),
                ],
                out_specs=pl.BlockSpec((pl.Squeezed(), C, hw_block), lambda b, t: (b, 0, t)),
            ),
            compiler_params=cparams(("parallel", "parallel")),
        )(x, scale)

    return out.reshape(B, C, H, W)


# ---------------------------------------------------------------------------
# Pure-JAX reference mirroring the PyTorch forward
# ---------------------------------------------------------------------------

def _eca_reference(x_nchw, conv_weight):
    B, C, H, W = x_nchw.shape
    K = conv_weight.shape[0]
    pad = K // 2
    avg = jnp.mean(x_nchw.astype(jnp.float32), axis=(2, 3))          # (B, C)
    avg_p = jnp.pad(avg, ((0, 0), (pad, pad)))                        # (B, C+2p)
    conv = sum(conv_weight[j] * avg_p[:, j:j + C] for j in range(K))  # (B, C)
    scale = jax.nn.sigmoid(conv)[:, :, None, None]                    # (B, C, 1, 1)
    return (scale * x_nchw.astype(jnp.float32)).astype(x_nchw.dtype)


if __name__ == "__main__":
    # Module hyper-params (match EAC.__init__ for channle=C, b=1, gamma=2)
    B, C, H, W = 2, 16, 16, 16
    b_hp, gamma = 1, 2
    kernel_size = int(abs((math.log(C, 2) + b_hp) / gamma))
    kernel_size = kernel_size if kernel_size % 2 else kernel_size + 1  # -> 3 for C=16

    key = jax.random.PRNGKey(0)
    kx, kw = jax.random.split(key)
    x = jax.random.normal(kx, (B, C, H, W), dtype=jnp.float32)
    # Conv1d(1, 1, k, bias=False) weight has shape (1, 1, k); keep the k taps.
    conv_w = jax.random.normal(kw, (kernel_size,), dtype=jnp.float32) * 0.1

    y_ref = _eca_reference(x, conv_w)

    # Fused single-pass path (auto-selected for this size).
    y_fused = jax.block_until_ready(eca_forward(x, conv_w))
    assert y_fused.shape == (B, C, H, W)
    assert jnp.allclose(y_fused, y_ref, atol=1e-5, rtol=1e-5)

    # Two-phase tiled path (forced) -- used for large feature maps / v7x VMEM.
    y_tiled = jax.block_until_ready(eca_forward(x, conv_w, hw_block=128))
    assert y_tiled.shape == (B, C, H, W)
    assert jnp.allclose(y_tiled, y_ref, atol=1e-5, rtol=1e-5)

    print("KERNEL_OK")
</pallas_src>

<mosaic_0001>
module attributes {stable_mosaic.version = 11 : i64} {
  func.func @_eca_fused_kernel(%arg0: i32, %arg1: memref<1x16x256xf32, #tpu.memory_space<vmem>>, %arg2: memref<16x16xf32, #tpu.memory_space<vmem>>, %arg3: memref<1x16x256xf32, #tpu.memory_space<vmem>>) attributes {dimension_semantics = [#tpu.dimension_semantics<parallel>], iteration_bounds = array<i64: 2>, scalar_prefetch = 0 : i64, scratch_operands = 0 : i64, tpu.core_type = #tpu.core_type<tc>, window_params = [{transform_indices = @transform_0, window_bounds = array<i64: 1, 16, 256>}, {pipeline_mode = #tpu.pipeline_mode<synchronous>, transform_indices = @transform_1, window_bounds = array<i64: 16, 16>}, {transform_indices = @transform_2, window_bounds = array<i64: 1, 16, 256>}]} {
    %c0 = arith.constant 0 : index
    %c0_0 = arith.constant 0 : index
    %c0_1 = arith.constant 0 : index
    %0 = vector.load %arg1[%c0, %c0_0, %c0_1] : memref<1x16x256xf32, #tpu.memory_space<vmem>>, vector<1x16x256xf32>
    %1 = vector.shape_cast %0 : vector<1x16x256xf32> to vector<16x256xf32>
    %cst = arith.constant dense<0.000000e+00> : vector<16xf32>
    %2 = vector.multi_reduction <add>, %1, %cst [1] : vector<16x256xf32> to vector<16xf32>
    %3 = vector.shape_cast %2 : vector<16xf32> to vector<16x1xf32>
    %cst_2 = arith.constant 3.906250e-03 : f32
    %4 = vector.broadcast %cst_2 : f32 to vector<16x1xf32>
    %5 = arith.mulf %3, %4 : vector<16x1xf32>
    %c0_3 = arith.constant 0 : index
    %c0_4 = arith.constant 0 : index
    %6 = vector.load %arg2[%c0_3, %c0_4] : memref<16x16xf32, #tpu.memory_space<vmem>>, vector<16x16xf32>
    %cst_5 = arith.constant dense<0.000000e+00> : vector<16x1xf32>
    %7 = tpu.matmul %6, %5, %cst_5 {dimension_numbers = #tpu.dot_dimension_numbers<[1], [0], [0], [1], [0, 0, 1, 1], [], []>} : vector<16x16xf32>, vector<16x1xf32>, vector<16x1xf32> -> vector<16x1xf32>
    %8 = arith.negf %7 : vector<16x1xf32>
    %9 = math.exp %8 : vector<16x1xf32>
    %cst_6 = arith.constant 1.000000e+00 : f32
    %10 = vector.broadcast %cst_6 : f32 to vector<16x1xf32>
    %11 = arith.addf %10, %9 : vector<16x1xf32>
    %12 = arith.divf %10, %11 : vector<16x1xf32>
    %13 = vector.broadcast %12 : vector<16x1xf32> to vector<16x256xf32>
    %14 = arith.mulf %1, %13 : vector<16x256xf32>
    %c0_7 = arith.constant 0 : index
    %c0_8 = arith.constant 0 : index
    %c0_9 = arith.constant 0 : index
    %15 = vector.load %arg3[%c0_7, %c0_8, %c0_9] : memref<1x16x256xf32, #tpu.memory_space<vmem>>, vector<1x16x256xf32>
    %16 = vector.shape_cast %15 : vector<1x16x256xf32> to vector<16x256xf32>
    %17 = vector.shape_cast %14 : vector<16x256xf32> to vector<1x16x256xf32>
    tpu.vector_store %arg3[%c0_7, %c0_8, %c0_9], %17 {strides = array<i32>} : memref<1x16x256xf32, #tpu.memory_space<vmem>>, vector<1x16x256xf32>,
    return
  }
  func.func @transform_0(%arg0: i32) -> (i32, i32, i32) {
    %c0_i32 = arith.constant 0 : i32
    %c0_i32_0 = arith.constant 0 : i32
    %c0_i32_1 = arith.constant 0 : i32
    return %arg0, %c0_i32, %c0_i32_0 : i32, i32, i32
  }
  func.func @transform_1(%arg0: i32) -> (i32, i32) {
    %c0_i32 = arith.constant 0 : i32
    %c0_i32_0 = arith.constant 0 : i32
    %c0_i32_1 = arith.constant 0 : i32
    return %c0_i32, %c0_i32_0 : i32, i32
  }
  func.func @transform_2(%arg0: i32) -> (i32, i32, i32) {
    %c0_i32 = arith.constant 0 : i32
    %c0_i32_0 = arith.constant 0 : i32
    %c0_i32_1 = arith.constant 0 : i32
    return %arg0, %c0_i32, %c0_i32_0 : i32, i32, i32
  }
}

</mosaic_0001>

<bundles_post_ra>
// kernel: tpu_custom_call.1
= control target key start
LH: loop header
LB: loop body
LE: loop exit
PB: predicated region body
PF: predicated region fallthrough
CT: control target
= control target key end

     0   :  { %7 = vsyncpa [#allocation3], 0  ;;  %s871_s0 = inlined_call_operand.hbm [shape: f32[2,16,256], index: 0, kind: input, shape index: {}]   ;;  %s872_s1 = inlined_call_operand.hbm [shape: f32[16,16], index: 1, kind: input, shape index: {}]   ;;  %s873_s2 = inlined_call_operand.hbm [shape: f32[2,16,256], index: 2, kind: output, shape index: {}]  }
   0x1   :  { %9 = vsyncpa [#allocation3 + $0x1], 0 }
   0x2   :  { %10 = vsyncpa [#allocation6], 0 }
   0x3   :  { %11 = vsyncpa [#allocation4], 0 }
   0x4   :  { %13 = vsyncpa [#allocation4 + $0x1], 0  ;;  %s666_s9 = smov 0   ;;  %s668_s10 = smov 0  }
   0x5   :  { %s670_s11 = smov 0   ;;  %s672_s12 = smov 0  }
   0x6 LB: > { %s687_s13 = sadd.s32 4294967295, %s639_s12   ;;  %s400_s14 = sadd.s32 4294967294, %s639_s12   ;;  %s639_s12 = sphi %s672_s12, %s893_s12   ;;  %s635_s11 = sphi %s670_s11, %s892_s11   ;;  %s631_s10 = sphi %s668_s10, %s891_s10   ;;  %s627_s9 = sphi %s666_s9, %s890_s9  }
   0x7   : > { %p39_p0 = scmp.ne.s32.totalorder %s631_s10, %s627_s9  ;;  %p874_p1 = scmp.eq.s32.totalorder %s687_s13, 0 }
   0x8   : > { %p90_p3 = scmp.eq.s32.totalorder %s400_s14, 1  ;;  %p401_p5 = scmp.ge.s32.totalorder %s639_s12, 1 }
   0x9   : > { %p696_p4 = por %p874_p1, %p39_p0  ;;  %p97_p7 = scmp.lt.s32.totalorder %s639_s12, 3 }
   0xa   : > { %p701_p6 = por %p90_p3, %p39_p0  ;;  %s641_s18 = smov [#allocation5]  }
   0xb   : > { %s877_s15 = scalar_select %p696_p4, 1, 0 }
   0xc   : > { %s878_s16 = scalar_select %p701_p6, 1, 0 }
   0xd   : > { %p706_p8 = pnand %p401_p5, %p97_p7  ;;  %s109_s19 = sshll.u32 %s641_s18, 4  ;;  %s710_s19 = int_to_ptr.vmem [resolvable:$true] %s109_s19 }
   0xe   : > { %s722_s21 = sadd.s32 1, %s639_s12   ;;  %s26_s22 = sadd.s32 1, %s635_s11 }
   0xf   : > { %s879_s17 = scalar_select %p706_p8, 1, 0 }
  0x10   : > { %p445_p9 = pneg %p706_p8  ;;  %s23_s23 = ssub.s32 %s639_s12, %s722_s21 }
  0x11   : > { %s511_s26 = scalar_lea.hbm %s872_s1, 256 }
  0x12   : > { %p717_p11 = pnand %p445_p9, %p874_p1  ;;  %p512_p12 = scmp.ne.s32.totalorder %s872_s1, %s511_s26 }
  0x13   : > { %p518_p5 = scmp.lt.u32.totalorder %s511_s26, %s872_s1 }
  0x14   : > { %p513_p13 = pneg %p717_p11 }
  0x16   : > { %p514_p0 = pnand %p513_p13, %p512_p12 }
  0x18   : > { %p515_p3 = pneg %p514_p0 }
  0x1a   : > { %p520_p7 = pnand %p518_p5, %p515_p3 }
  0x1c   : > { %523 = shalt.err (!%p520_p7)
}
  0x1d   : > { %s524_s3 = scalar_lea.vmem %s710_s19, 256  ;;  %p532_p2 = scmp.lt.s32.totalorder %s710_s19, %s710_s19 }
  0x1e   : > { %p525_p9 = scmp.ne.s32.totalorder %s710_s19, %s524_s3  ;;  %p533_p6 = scmp.lt.s32.totalorder %s524_s3, %s524_s3 }
  0x20   : > { %p527_p10 = pnand %p525_p9, %p513_p13  ;;  %p534_p4 = por %p533_p6, %p532_p2 }
  0x22   : > { %p528_p1 = pneg %p527_p10 }
  0x24   : > { %p535_p8 = pnand %p534_p4, %p528_p1 }
  0x26   : > { %538 = shalt.err (!%p535_p8)
}
  0x27   : > { %s642_s4 = smov 128   ;;  %s643_s5 = smov 8  }
  0x28   : > { %448 = dma.hbm_to_vmem [thread:$0]  (!%p717_p11), %s872_s1, 256, %s710_s19, [#allocation6], %s642_s4, %s642_s4, %s643_s5  }
  0x29   : > { %p24_p2 = scmp.eq.s32.totalorder %s23_s23, 0  ;;  %p33_p1 = scmp.ne.s32.totalorder %s635_s11, %s631_s10 }
  0x2a   : > { %p34_p4 = scmp.eq.s32.totalorder %s639_s12, 0  ;;  %p458_p6 = scmp.lt.s32.totalorder %s639_s12, 2 }
  0x2b   : > { %s753_s8 = scalar_select %p24_p2, %s635_s11, %s26_s22  }
  0x2c   : > { %p35_p8 = por %p34_p4, %p33_p1  ;;  %p881_p10 = scmp.eq.s32.totalorder %s687_s13, 1 }
  0x2d   : > { %s123_s18 = sand.u32 1, %s635_s11   ;;  %s420_s24 = sshll.u32 %s639_s12, 9 }
  0x2e   : > { %p757_p12 = por %p881_p10, %p33_p1  ;;  %s404_s25 = sshll.u32 %s123_s18, 5 }
  0x2f   : > { %s766_s27 = scalar_lea.hbm %s871_s0, %s420_s24  ;;  %s127_s19 = scalar_lea.vmem [#allocation2], %s404_s25 }
  0x30   : > { %s134_s22 = sshll.u32 %s127_s19, 4  ;;  %p768_p11 = pnand %p458_p6, %p35_p8  ;;  %s772_s22 = int_to_ptr.vmem [resolvable:$true] %s134_s22 }
  0x31   : > { %s774_s28 = scalar_lea.sflag [#allocation3], %s123_s18  ;;  %s539_s29 = scalar_lea.hbm %s766_s27, 512 }
  0x32   : > { %p540_p13 = scmp.ne.s32.totalorder %s766_s27, %s539_s29  ;;  %p541_p0 = pneg %p768_p11 }
  0x33   : > { %s544_s4 = scalar_lea.hbm %s871_s0, 1024  ;;  %p545_p7 = scmp.lt.u32.totalorder %s766_s27, %s871_s0 }
  0x34   : > { %p542_p3 = pnand %p541_p0, %p540_p13  ;;  %p546_p9 = scmp.lt.u32.totalorder %s544_s4, %s539_s29 }
  0x35   : > { %p548_p1 = scmp.lt.u32.totalorder %s539_s29, %s766_s27 }
  0x36   : > { %p543_p5 = pneg %p542_p3  ;;  %p547_p2 = por %p546_p9, %p545_p7 }
  0x38   : > { %p549_p4 = por %p548_p1, %p547_p2 }
  0x3a   : > { %p550_p6 = pnand %p549_p4, %p543_p5 }
  0x3c   : > { %553 = shalt.err (!%p550_p6)
}
  0x3d   : > { %s554_s7 = scalar_lea.vmem %s772_s22, 512  ;;  %s644_s18 = smov [#allocation2]  }
  0x3e   : > { %p555_p8 = scmp.ne.s32.totalorder %s772_s22, %s554_s7  ;;  %s559_s24 = sshll.u32 %s644_s18, 4  ;;  %s560_s24 = int_to_ptr.vmem [resolvable:$false] %s559_s24 }
  0x3f   : > { %s561_s25 = scalar_lea.vmem %s560_s24, 1024  ;;  %p562_p3 = scmp.lt.s32.totalorder %s772_s22, %s560_s24 }
  0x40   : > { %p557_p10 = pnand %p555_p8, %p541_p0  ;;  %p563_p7 = scmp.lt.s32.totalorder %s561_s25, %s554_s7 }
  0x42   : > { %p558_p13 = pneg %p557_p10  ;;  %p564_p9 = por %p563_p7, %p562_p3 }
  0x44   : > { %p565_p2 = pnand %p564_p9, %p558_p13 }
  0x46   : > { %568 = shalt.err (!%p565_p2)
}
  0x47   : > { %s645_s20 = smov 256   ;;  %s646_s26 = smov 16  }
  0x48   : > { %452 = dma.hbm_to_vmem [thread:$0]  (!%p768_p11), %s766_s27, 512, %s772_s22, %s774_s28, %s645_s20, %s645_s20, %s646_s26  }
  0x49   : > { %p884_p0 = scmp.ne.s32.totalorder %s879_s17, 0 }
  0x4a   : > { %s805_s19 = sand.u32 (!%p884_p0), 1, %s631_s10   ;;  %p885_p5 = scmp.ne.s32.totalorder (!%p884_p0), %s877_s15, 0 }
  0x4b   : > { %146 = sbr.rel (%p884_p0) target bundleno = 631 (0x277), region = 28  ;;  %s408_s29 = sshll.u32 (!%p884_p0), %s805_s19, 5 }
  0x4c   : > { %s149_s30 = scalar_lea.sflag (!%p884_p0), [#allocation3], %s805_s19  ;;  %s152_s3 = scalar_lea.vmem (!%p884_p0), [#allocation2], %s408_s29 }
  0x52   : > { %614 = dma.done.wait (%p885_p5), %s149_s30, 512  }
  0x53   : > { %616 = vsyncadd (%p885_p5), %s149_s30, 4294966784  ;;  %p886_p11 = scmp.eq.s32.totalorder %s687_s13, 0 }
  0x55   : > { %618 = dma.done.wait (%p886_p11), [#allocation6], 256   ;;  %p887_p1 = pmov %p886_p11 }
  0x56   : > { %v177_v0 = vld [vmem:[%s152_s3] sm:$0xff]  ;;  %v178_v1 = vld [vmem:[%s152_s3 + $0x8] sm:$0xff]  ;;  %v179_v2 = vld [vmem:[%s152_s3 + $0x10] sm:$0xff]  ;;  %vm191_vm0 = vcmask 130048   ;;  %v647_v13 = vmov 0   ;;  %s176_s15 = scalar_lea.vmem [#allocation7], %s408_s29 }
  0x57   : > { %620 = vsyncadd (%p887_p1), [#allocation6], 4294967040  ;;  %v181_v3 = vadd.f32 %v178_v1, %v177_v0  ;;  %v180_v4 = vld [vmem:[%s152_s3 + $0x18] sm:$0xff]  ;;  %v189_v6 = vld [vmem:[#allocation5] sm:$0xff]  ;;  %501 = vset.pattern.permute.xlu1 %v647_v13  ;;  %502 = vset.pattern.permute.xlu0 %v647_v13  ;;  %s317_s17 = sshll.u32 %s176_s15, 4  ;;  %s421_s27 = sshll.u32 %s687_s13, 9  ;;  %s822_s17 = int_to_ptr.vmem [resolvable:$true] %s317_s17 }
  0x58   : > { %v184_v5 = vadd.f32 %v180_v4, %v179_v2  ;;  %430 = vmatprep.mubr.msk.f32.mxu0 %vm191_vm0, %v189_v6  ;;  %v190_v12 = vld [vmem:[#allocation5 + $0x8] sm:$0xff]  ;;  %s827_s28 = scalar_lea.hbm %s873_s2, %s421_s27  ;;  %s304_s4 = scalar_lea.sflag [#allocation4], %s805_s19 }
  0x59   : > { %182 = vadd.xlane.f32.xlu0 %v181_v3  ;;  %s569_s5 = scalar_lea.vmem %s822_s17, 512  ;;  %s648_s13 = smov [#allocation7]  }
  0x5a   : > { %p570_p4 = scmp.ne.s32.totalorder %s822_s17, %s569_s5  ;;  %s573_s6 = sshll.u32 %s648_s13, 4  ;;  %s574_s6 = int_to_ptr.vmem [resolvable:$false] %s573_s6 }
  0x5b   : > { %s575_s7 = scalar_lea.vmem %s574_s6, 1024  ;;  %p576_p10 = scmp.lt.s32.totalorder %s822_s17, %s574_s6 }
  0x5c   : > { %p571_p6 = pnand %p570_p4, %p757_p12  ;;  %p577_p13 = scmp.lt.s32.totalorder %s575_s7, %s569_s5 }
  0x5d   : > { %185 = vadd.xlane.f32.xlu0 %v184_v5 }
  0x5e   : > { %p572_p8 = pneg %p571_p6  ;;  %p578_p3 = por %p577_p13, %p576_p10 }
  0x60   : > { %p579_p7 = pnand %p578_p3, %p572_p8 }
  0xe6   : > { %v183_v7 = vpop.xlane.xlu0 %182 }
  0xe7   : > { %v187_v9 = vmul.f32 0.00390625, %v183_v7 }
  0xea   : > { %v186_v8 = vpop.xlane.xlu0 %185 }
  0xeb   : > { %v188_v10 = vmul.f32 0.00390625, %v186_v8 }
  0xed   : > { %v433_v11 = vpack.c.bf16 %v188_v10, %v187_v9 }
  0xef   : > { %434 = vmatprep.subr.bf16.mxu0 %v433_v11 }
  0xf0   : > { %436 = vmatpush3.bf16.msra.mxu0 %v433_v11 }
  0xf3   : > { %431 = vmatmul.mubr.msk.f32.vlgmr.msra.gmra.mrb[0].mxu0 %vm191_vm0, %v190_v12 }
 0x1c6   : > { %v432_v14 = vpop.f32.mrb[0].mxu0 }
 0x1c7   : > { %v414_v15 = vmul.f32 -1.442695, %v432_v14  ;;  %v264_v16 = vpop.f32.mrb[1].mxu0 }
 0x1c8   : > { %v413_v17 = vmul.f32 -1.442695, %v264_v16 }
 0x1c9   : > { %503 = vpow2.f32 %v414_v15 }
 0x1ca   : > { %505 = vpow2.f32 %v413_v17 }
 0x1d3   : > { %v504_v18 = vpop.eup %503 }
 0x1d4   : > { %v506_v19 = vpop.eup %505  ;;  %v280_v21 = vadd.f32 1.0, %v504_v18 }
 0x1d5   : > { %v279_v20 = vadd.f32 1.0, %v506_v19 }
 0x1d7   : > { %507 = vrcp.f32 %v279_v20 }
 0x1d8   : > { %509 = vrcp.f32 %v280_v21 }
 0x1e1   : > { %v508_v22 = vpop.eup %507 }
 0x1e2   : > { %287 = vperm.xlu1 %501, %v508_v22   ;;  %v510_v23 = vpop.eup %509 }
 0x1e6   : > { %292 = vperm.xlu1 %501, %v510_v23  }
 0x261   : > { %v288_v24 = vpop.permute.xlu1 %287 }
 0x262   : > { %v295_v25 = vmul.f32 %v288_v24, %v177_v0  ;;  %v296_v26 = vmul.f32 %v288_v24, %v178_v1 }
 0x264   : > { %299 = vst [vmem:[%s176_s15] sm:$0xff] %v295_v25  ;;  %300 = vst [vmem:[%s176_s15 + $0x8] sm:$0xff] %v296_v26 }
 0x265   : > { %v293_v27 = vpop.permute.xlu1 %292 }
 0x266   : > { %v297_v28 = vmul.f32 %v293_v27, %v179_v2  ;;  %v298_v29 = vmul.f32 %v293_v27, %v180_v4 }
 0x268   : > { %301 = vst [vmem:[%s176_s15 + $0x10] sm:$0xff] %v297_v28  ;;  %302 = vst [vmem:[%s176_s15 + $0x18] sm:$0xff] %v298_v29 }
 0x269   : > { %582 = shalt.err (!%p579_p7)
}
 0x26a   : > { %s583_s18 = scalar_lea.hbm %s827_s28, 512  ;;  %s587_s20 = scalar_lea.hbm %s873_s2, 1024 }
 0x26b   : > { %p584_p9 = scmp.ne.s32.totalorder %s827_s28, %s583_s18  ;;  %p588_p5 = scmp.lt.u32.totalorder %s827_s28, %s873_s2 }
 0x26c   : > { %p589_p11 = scmp.lt.u32.totalorder %s587_s20, %s583_s18  ;;  %p591_p4 = scmp.lt.u32.totalorder %s583_s18, %s827_s28 }
 0x26d   : > { %p585_p2 = pnand %p584_p9, %p757_p12 }
 0x26e   : > { %p590_p1 = por %p589_p11, %p588_p5 }
 0x26f   : > { %p586_p0 = pneg %p585_p2 }
 0x270   : > { %p592_p6 = por %p591_p4, %p590_p1 }
 0x272   : > { %p593_p8 = pnand %p592_p6, %p586_p0 }
 0x274   : > { %596 = shalt.err (!%p593_p8)
}
 0x275   : > { %s649_s30 = smov 256   ;;  %s650_s3 = smov 16  }
 0x276   : > { %443 = dma.vmem_to_hbm [thread:$0]  (%p757_p12), %s822_s17, 512, %s827_s28, %s304_s4, %s649_s30, %s649_s30, %s650_s3  }
 0x277 PF: > { %s332_s15 = sand.u32 1, %s627_s9   ;;  %p888_p10 = scmp.ne.s32.totalorder %s878_s16, 0 }
 0x278   : > { %p889_p13 = scmp.ge.s32.totalorder %s639_s12, 2  ;;  %s333_s27 = scalar_lea.sflag [#allocation4], %s332_s15 }
 0x27a   : > { %p454_p3 = pnand %p889_p13, %p888_p10 }
 0x27c   : > { %622 = dma.done.wait (!%p454_p3), %s333_s27, 512  }
 0x27d   : > { %624 = vsyncadd (!%p454_p3), %s333_s27, 4294966784  ;;  %p16_p7 = scmp.ge.s32.totalorder %s722_s21, 4   ;;  %s890_s9 = smov %s631_s10 }
 0x27e   : > { %s891_s10 = smov %s635_s11  ;;  %s892_s11 = smov %s753_s8 }
 0x27f   : > { %s893_s12 = smov %s722_s21  ;;  %18 = sbr.rel (!%p16_p7) target bundleno = 6 (0x6), region = 77 }
 0x286   :  { %338 = vsyncpa [#allocation3], 1 }
 0x287   :  { %340 = vsyncpa [#allocation3 + $0x1], 1 }
 0x288   :  { %341 = vsyncpa [#allocation6], 1 }
 0x289   :  { %342 = vsyncpa [#allocation4], 1 }
 0x28a   :  { %344 = vsyncpa [#allocation4 + $0x1], 1 }

</bundles_post_ra>
